<compile_context>
chip_gen: v7x
topology: tpu7x:2x2x1
jax: 0.10.0
libtpu: 0.0.40
codegen_flags: <defaults>
</compile_context>

<pallas_src>
import jax
import jax.numpy as jnp
from jax.experimental import pallas as pl
from jax.experimental.pallas import tpu as pltpu

NEG_SLOPE = 0.5


def _leaky_relu(x):
    # LeakyReLU(x, 0.5) == max(x, 0.5 * x) because 0 < 0.5 < 1 (cheaper than cmp+select).
    return jnp.maximum(x, NEG_SLOPE * x)


# ----------------------------- kernels ---------------------------------------


def _gcn_kernel_resident(adj_ref, emb_ref, out_ref):
    """One (tm, Dp) output tile; full embeds resident in VMEM, single dot."""
    acc = jnp.dot(adj_ref[...], emb_ref[...], preferred_element_type=jnp.float32)
    out_ref[...] = _leaky_relu(acc).astype(out_ref.dtype)


def _gcn_kernel_ktiled(adj_ref, emb_ref, out_ref, acc_ref):
    """Fallback: reduction over K grid axis with an f32 VMEM accumulator."""
    k = pl.program_id(1)

    @pl.when(k == 0)
    def _():
        acc_ref[...] = jnp.zeros_like(acc_ref)

    acc_ref[...] += jnp.dot(
        adj_ref[...], emb_ref[...], preferred_element_type=jnp.float32
    )

    @pl.when(k == pl.num_programs(1) - 1)
    def _():
        acc = acc_ref[...]
        out_ref[...] = _leaky_relu(acc).astype(out_ref.dtype)


# ----------------------------- wrapper ----------------------------------------


def _round_up(x, m):
    return ((x + m - 1) // m) * m


def _pad_to_shape(x, rows, cols):
    r, c = x.shape
    if r != rows or c != cols:
        x = jnp.pad(x, ((0, rows - r), (0, cols - c)))
    return x


def gcn_layer(
    adj,
    embeds,
    *,
    use_bf16_matmul=False,          # bf16 MXU operands w/ f32 accumulation (v6e/v7x win)
    tm_target=512,                  # adj row-tile target (big tiles -> HBM roofline)
    tk_target=512,                  # K tile for the fallback path
    resident_vmem_budget=40 * 1024 * 1024,  # conservative for v7x (64 MiB physical)
):
    """LeakyReLU(adj @ embeds, negative_slope=0.5) via Pallas TPU kernels."""
    M, K = adj.shape
    K2, D = embeds.shape
    assert K == K2, "adj.shape[1] must match embeds.shape[0]"

    out_dtype = embeds.dtype
    if use_bf16_matmul:
        adj = adj.astype(jnp.bfloat16)
        embeds = embeds.astype(jnp.bfloat16)

    adj_item = jnp.dtype(adj.dtype).itemsize
    emb_item = jnp.dtype(embeds.dtype).itemsize
    out_item = jnp.dtype(out_dtype).itemsize

    # Feature dim padded to lane width for unmasked, lane-dense output stores.
    Dp = _round_up(D, 128)

    # Row tile: one big tile for small graphs, 512-row tiles otherwise.
    if M <= tm_target:
        tm = _round_up(M, 8)
        Mp = tm
    else:
        tm = tm_target
        Mp = _round_up(M, tm)

    # Can the whole (padded) embeds matrix + a double-buffered adj tile live in VMEM?
    Kp_res = _round_up(K, 128)
    resident_bytes = (
        2 * tm * Kp_res * adj_item      # double-buffered adj row tile
        + 2 * Kp_res * Dp * emb_item    # embeds (counted x2 to stay safe)
        + 2 * tm * Dp * out_item        # double-buffered output tile
    )
    resident = resident_bytes <= resident_vmem_budget

    # Advisory cost for XLA's scheduler around this custom call.
    cost = pl.CostEstimate(
        flops=2 * M * K * D,
        transcendentals=0,
        bytes_accessed=(M * K + K * D) * adj_item + M * D * out_item,
    )

    if resident:
        Kp = Kp_res
        adj_p = _pad_to_shape(adj, Mp, Kp)
        emb_p = _pad_to_shape(embeds, Kp, Dp)

        vmem_limit = int(max(32 * 1024 * 1024, resident_bytes + (4 << 20)))
        out_p = pl.pallas_call(
            _gcn_kernel_resident,
            out_shape=jax.ShapeDtypeStruct((Mp, Dp), out_dtype),
            grid_spec=pltpu.PrefetchScalarGridSpec(
                num_scalar_prefetch=0,
                grid=(Mp // tm,),
                in_specs=[
                    pl.BlockSpec((tm, Kp), lambda i: (i, 0)),   # adj row tile
                    pl.BlockSpec((Kp, Dp), lambda i: (0, 0)),   # embeds: resident, no re-DMA
                ],
                out_specs=pl.BlockSpec((tm, Dp), lambda i: (i, 0)),
            ),
            compiler_params=pltpu.CompilerParams(
                dimension_semantics=("parallel",),
                vmem_limit_bytes=vmem_limit,
            ),
            cost_estimate=cost,
        )(adj_p, emb_p)
    else:
        tk = tk_target
        Kp = _round_up(K, tk)
        adj_p = _pad_to_shape(adj, Mp, Kp)
        emb_p = _pad_to_shape(embeds, Kp, Dp)

        ktiled_bytes = (
            2 * tm * tk * adj_item
            + 2 * tk * Dp * emb_item
            + 2 * tm * Dp * out_item
            + tm * Dp * 4               # f32 accumulator scratch
        )
        vmem_limit = int(max(32 * 1024 * 1024, ktiled_bytes + (4 << 20)))
        out_p = pl.pallas_call(
            _gcn_kernel_ktiled,
            out_shape=jax.ShapeDtypeStruct((Mp, Dp), out_dtype),
            grid_spec=pltpu.PrefetchScalarGridSpec(
                num_scalar_prefetch=0,
                grid=(Mp // tm, Kp // tk),
                in_specs=[
                    pl.BlockSpec((tm, tk), lambda i, k: (i, k)),
                    pl.BlockSpec((tk, Dp), lambda i, k: (k, 0)),
                ],
                out_specs=pl.BlockSpec((tm, Dp), lambda i, k: (i, 0)),
                scratch_shapes=[pltpu.VMEM((tm, Dp), jnp.float32)],
            ),
            compiler_params=pltpu.CompilerParams(
                dimension_semantics=("parallel", "arbitrary"),
                vmem_limit_bytes=vmem_limit,
            ),
            cost_estimate=cost,
        )(adj_p, emb_p)

    return out_p[:M, :D]


# ----------------------------- demo / check ------------------------------------


def _reference(adj, embeds):
    out = adj @ embeds
    return jnp.where(out >= 0, out, NEG_SLOPE * out)


if __name__ == "__main__":
    key = jax.random.PRNGKey(0)
    k_adj, k_emb, k_adj2, k_emb2 = jax.random.split(key, 4)

    ok = True

    # Case 1: nice shapes (256 nodes, 128-dim embeddings).
    N_NODES, HIDDEN = 256, 128
    adj_dense = jax.random.uniform(k_adj, (N_NODES, N_NODES), dtype=jnp.float32)
    adj = adj_dense * (adj_dense > 0.8).astype(jnp.float32)   # ~20% nonzeros
    embeds = jax.random.normal(k_emb, (N_NODES, HIDDEN), dtype=jnp.float32)

    out = jax.block_until_ready(gcn_layer(adj, embeds))
    ref = _reference(adj, embeds)
    ok &= out.shape == (N_NODES, HIDDEN)
    ok &= bool(jnp.allclose(out, ref, atol=1e-4, rtol=1e-4))

    # Case 2: ragged shapes (exercise zero-padding path).
    N2, D2 = 200, 96
    adj2_dense = jax.random.uniform(k_adj2, (N2, N2), dtype=jnp.float32)
    adj2 = adj2_dense * (adj2_dense > 0.8).astype(jnp.float32)
    embeds2 = jax.random.normal(k_emb2, (N2, D2), dtype=jnp.float32)

    out2 = jax.block_until_ready(gcn_layer(adj2, embeds2))
    ref2 = _reference(adj2, embeds2)
    ok &= out2.shape == (N2, D2)
    ok &= bool(jnp.allclose(out2, ref2, atol=1e-4, rtol=1e-4))

    assert ok, "mismatch vs reference"
    print("KERNEL_OK")
</pallas_src>

<mosaic_0001>
module attributes {stable_mosaic.version = 11 : i64} {
  func.func @_gcn_kernel_resident(%arg0: i32, %arg1: memref<256x256xf32, #tpu.memory_space<vmem>>, %arg2: memref<256x128xf32, #tpu.memory_space<vmem>>, %arg3: memref<256x128xf32, #tpu.memory_space<vmem>>) attributes {dimension_semantics = [#tpu.dimension_semantics<parallel>], iteration_bounds = array<i64: 1>, scalar_prefetch = 0 : i64, scratch_operands = 0 : i64, tpu.core_type = #tpu.core_type<tc>, window_params = [{transform_indices = @transform_0, window_bounds = array<i64: 256, 256>}, {pipeline_mode = #tpu.pipeline_mode<synchronous>, transform_indices = @transform_1, window_bounds = array<i64: 256, 128>}, {transform_indices = @transform_2, window_bounds = array<i64: 256, 128>}]} {
    %c0 = arith.constant 0 : index
    %c0_0 = arith.constant 0 : index
    %0 = vector.load %arg1[%c0, %c0_0] : memref<256x256xf32, #tpu.memory_space<vmem>>, vector<256x256xf32>
    %c0_1 = arith.constant 0 : index
    %c0_2 = arith.constant 0 : index
    %1 = vector.load %arg2[%c0_1, %c0_2] : memref<256x128xf32, #tpu.memory_space<vmem>>, vector<256x128xf32>
    %cst = arith.constant dense<0.000000e+00> : vector<256x128xf32>
    %2 = tpu.matmul %0, %1, %cst {dimension_numbers = #tpu.dot_dimension_numbers<[1], [0], [0], [1], [0, 0, 1, 1], [], []>} : vector<256x256xf32>, vector<256x128xf32>, vector<256x128xf32> -> vector<256x128xf32>
    %cst_3 = arith.constant 5.000000e-01 : f32
    %3 = vector.broadcast %cst_3 : f32 to vector<256x128xf32>
    %4 = arith.mulf %3, %2 : vector<256x128xf32>
    %5 = arith.maximumf %2, %4 : vector<256x128xf32>
    %c0_4 = arith.constant 0 : index
    %c0_5 = arith.constant 0 : index
    %6 = vector.load %arg3[%c0_4, %c0_5] : memref<256x128xf32, #tpu.memory_space<vmem>>, vector<256x128xf32>
    tpu.vector_store %arg3[%c0_4, %c0_5], %5 {strides = array<i32>} : memref<256x128xf32, #tpu.memory_space<vmem>>, vector<256x128xf32>,
    return
  }
  func.func @transform_0(%arg0: i32) -> (i32, i32) {
    %c0_i32 = arith.constant 0 : i32
    %c0_i32_0 = arith.constant 0 : i32
    return %arg0, %c0_i32 : i32, i32
  }
  func.func @transform_1(%arg0: i32) -> (i32, i32) {
    %c0_i32 = arith.constant 0 : i32
    %c0_i32_0 = arith.constant 0 : i32
    %c0_i32_1 = arith.constant 0 : i32
    return %c0_i32, %c0_i32_0 : i32, i32
  }
  func.func @transform_2(%arg0: i32) -> (i32, i32) {
    %c0_i32 = arith.constant 0 : i32
    %c0_i32_0 = arith.constant 0 : i32
    return %arg0, %c0_i32 : i32, i32
  }
}

</mosaic_0001>

<bundles_post_ra>
// kernel: tpu_custom_call.1
= control target key start
LH: loop header
LB: loop body
LE: loop exit
PB: predicated region body
PF: predicated region fallthrough
CT: control target
= control target key end

     0   :  { %7 = vsyncpa [#allocation3], 0  ;;  %s732_s0 = inlined_call_operand.hbm [shape: f32[256,256], index: 0, kind: input, shape index: {}]   ;;  %s733_s1 = inlined_call_operand.hbm [shape: f32[256,128], index: 1, kind: input, shape index: {}]   ;;  %s734_s2 = inlined_call_operand.hbm [shape: f32[256,128], index: 2, kind: output, shape index: {}]  }
   0x1   :  { %8 = vsyncpa [#allocation6], 0 }
   0x2   :  { %9 = vsyncpa [#allocation4], 0  ;;  %s635_s9 = smov [#allocation2]   ;;  %s563_s13 = scalar_lea.hbm %s732_s0, 8192 }
   0x3   :  { %s15_s10 = sshll.u32 %s635_s9, 4  ;;  %p564_p0 = scmp.ne.s32.totalorder %s732_s0, %s563_s13  ;;  %s16_s10 = int_to_ptr.vmem [resolvable:$true] %s15_s10 }
   0x4   :  { %p567_p1 = scmp.lt.u32.totalorder %s563_s13, %s732_s0 }
   0x6   :  { %p569_p2 = pnand %p567_p1, %p564_p0 }
   0x8   :  { %572 = shalt.err (!%p569_p2)
}
   0x9   :  { %s573_s18 = scalar_lea.vmem %s16_s10, 8192  ;;  %p578_p4 = scmp.lt.s32.totalorder %s16_s10, %s16_s10 }
   0xa   :  { %p574_p3 = scmp.ne.s32.totalorder %s16_s10, %s573_s18  ;;  %p579_p5 = scmp.lt.s32.totalorder %s573_s18, %s573_s18 }
   0xc   :  { %p580_p6 = por %p579_p5, %p578_p4 }
   0xe   :  { %p581_p7 = pnand %p580_p6, %p574_p3 }
  0x10   :  { %584 = shalt.err (!%p581_p7)
}
  0x11   :  { %s636_s19 = smov 256   ;;  %s637_s20 = smov 16  }
  0x12   :  { %21 = dma.hbm_to_vmem [thread:$0]  %s732_s0, 8192, %s16_s10, [#allocation3], %s636_s19, %s636_s19, %s637_s20  }
  0x13   :  { %s638_s23 = smov [#allocation5]   ;;  %s585_s27 = scalar_lea.hbm %s733_s1, 4096 }
  0x14   :  { %s27_s24 = sshll.u32 %s638_s23, 4  ;;  %p586_p8 = scmp.ne.s32.totalorder %s733_s1, %s585_s27  ;;  %s28_s24 = int_to_ptr.vmem [resolvable:$true] %s27_s24 }
  0x15   :  { %p589_p9 = scmp.lt.u32.totalorder %s585_s27, %s733_s1 }
  0x17   :  { %p591_p10 = pnand %p589_p9, %p586_p8 }
  0x19   :  { %594 = shalt.err (!%p591_p10)
}
  0x1a   :  { %s595_s4 = scalar_lea.vmem %s28_s24, 4096  ;;  %p600_p12 = scmp.lt.s32.totalorder %s28_s24, %s28_s24 }
  0x1b   :  { %p596_p11 = scmp.ne.s32.totalorder %s28_s24, %s595_s4  ;;  %p601_p13 = scmp.lt.s32.totalorder %s595_s4, %s595_s4 }
  0x1d   :  { %p602_p0 = por %p601_p13, %p600_p12 }
  0x1f   :  { %p603_p1 = pnand %p602_p0, %p596_p11 }
  0x21   :  { %606 = shalt.err (!%p603_p1)
}
  0x22   :  { %s639_s0 = smov 128   ;;  %s640_s5 = smov 8  }
  0x23   :  { %33 = dma.hbm_to_vmem [thread:$0]  %s733_s1, 4096, %s28_s24, [#allocation6], %s639_s0, %s639_s0, %s640_s5  }
  0x24   :  { %629 = dma.done.wait [#allocation3], 8192  }
  0x25   :  { %630 = vsyncadd [#allocation3], 4294959104 }
  0x26   :  { %631 = dma.done.wait [#allocation6], 4096  }
  0x27   :  { %632 = vsyncadd [#allocation6], 4294963200  ;;  %v641_v0 = vmov 0.0|0.0   ;;  %v104_v1 = vld [vmem:[#allocation5] sm:$0xff]  ;;  %v105_v2 = vld [vmem:[#allocation5 + $0x8] sm:$0xff]  ;;  %s642_s1 = smov [#allocation7]  }
  0x28   :  { %475 = vmatprep.subr.bf16.mxu0 %v641_v0  ;;  %523 = vmatprep.subr.bf16.mxu1 %v641_v0  ;;  %v106_v3 = vld [vmem:[#allocation5 + $0x10] sm:$0xff]  ;;  %v476_v4 = vpack.c.bf16 %v105_v2, %v104_v1  ;;  %v107_v5 = vld [vmem:[#allocation5 + $0x18] sm:$0xff]  ;;  %v108_v7 = vld [vmem:[#allocation5 + $0x20] sm:$0xff]  ;;  %s462_s8 = sshll.u32 %s642_s1, 4  ;;  %s463_s8 = int_to_ptr.vmem [resolvable:$true] %s462_s8 }
  0x29   :  { %v479_v6 = vpack.c.bf16 %v107_v5, %v106_v3  ;;  %v109_v8 = vld [vmem:[#allocation5 + $0x28] sm:$0xff]  ;;  %v110_v10 = vld [vmem:[#allocation5 + $0x30] sm:$0xff]  ;;  %v111_v11 = vld [vmem:[#allocation5 + $0x38] sm:$0xff]  ;;  %s607_s9 = scalar_lea.vmem %s463_s8, 4096  ;;  %p612_p3 = scmp.lt.s32.totalorder %s463_s8, %s463_s8 }
  0x2a   :  { %477 = vmatpush1.bf16.msra.mxu0 %v476_v4  ;;  %539 = vmatpush1.bf16.msra.mxu1 %v476_v4  ;;  %v482_v9 = vpack.c.bf16 %v109_v8, %v108_v7  ;;  %v41_v12 = vld [vmem:[#allocation2 + $0x8] sm:$0xff]  ;;  %v485_v13 = vpack.c.bf16 %v111_v11, %v110_v10  ;;  %v112_v15 = vld [vmem:[#allocation5 + $0x40] sm:$0xff]  ;;  %v114_v18 = vld [vmem:[#allocation5 + $0x50] sm:$0xff]  ;;  %p608_p2 = scmp.ne.s32.totalorder %s463_s8, %s607_s9  ;;  %p613_p4 = scmp.lt.s32.totalorder %s607_s9, %s607_s9 }
  0x2b   :  { %478 = vmatprep.subr.bf16.mxu0 %v641_v0  ;;  %524 = vmatprep.subr.bf16.mxu1 %v641_v0  ;;  %v73_v14 = vld [vmem:[#allocation2 + $0x108] sm:$0xff]  ;;  %v115_v19 = vld [vmem:[#allocation5 + $0x58] sm:$0xff]  ;;  %v116_v21 = vld [vmem:[#allocation5 + $0x60] sm:$0xff] }
  0x2c   :  { %v113_v16 = vld [vmem:[#allocation5 + $0x48] sm:$0xff]  ;;  %200 = vmatprep.mubr.f32.mxu0 %v41_v12  ;;  %280 = vmatprep.mubr.f32.mxu1 %v73_v14  ;;  %v491_v20 = vpack.c.bf16 %v115_v19, %v114_v18  ;;  %v118_v24 = vld [vmem:[#allocation5 + $0x70] sm:$0xff]  ;;  %v119_v25 = vld [vmem:[#allocation5 + $0x78] sm:$0xff]  ;;  %p614_p5 = por %p613_p4, %p612_p3 }
  0x2d   :  { %v488_v17 = vpack.c.bf16 %v113_v16, %v112_v15  ;;  %v117_v22 = vld [vmem:[#allocation5 + $0x68] sm:$0xff]  ;;  %v497_v26 = vpack.c.bf16 %v119_v25, %v118_v24  ;;  %v120_v27 = vld [vmem:[#allocation5 + $0x80] sm:$0xff]  ;;  %v122_v30 = vld [vmem:[#allocation5 + $0x90] sm:$0xff] }
  0x2e   :  { %480 = vmatpush1.bf16.msra.mxu0 %v479_v6  ;;  %540 = vmatpush1.bf16.msra.mxu1 %v479_v6  ;;  %v494_v23 = vpack.c.bf16 %v117_v22, %v116_v21  ;;  %v121_v28 = vld [vmem:[#allocation5 + $0x88] sm:$0xff]  ;;  %v123_v31 = vld [vmem:[#allocation5 + $0x98] sm:$0xff]  ;;  %v124_v33 = vld [vmem:[#allocation5 + $0xa0] sm:$0xff]  ;;  %p615_p6 = pnand %p614_p5, %p608_p2 }
  0x2f   :  { %481 = vmatprep.subr.bf16.mxu0 %v641_v0  ;;  %525 = vmatprep.subr.bf16.mxu1 %v641_v0  ;;  %v500_v29 = vpack.c.bf16 %v121_v28, %v120_v27  ;;  %v503_v32 = vpack.c.bf16 %v123_v31, %v122_v30  ;;  %v125_v34 = vld [vmem:[#allocation5 + $0xa8] sm:$0xff]  ;;  %v126_v36 = vld [vmem:[#allocation5 + $0xb0] sm:$0xff]  ;;  %v127_v37 = vld [vmem:[#allocation5 + $0xb8] sm:$0xff] }
  0x30   :  { %v506_v35 = vpack.c.bf16 %v125_v34, %v124_v33  ;;  %v509_v38 = vpack.c.bf16 %v127_v37, %v126_v36  ;;  %v128_v39 = vld [vmem:[#allocation5 + $0xc0] sm:$0xff]  ;;  %v129_v40 = vld [vmem:[#allocation5 + $0xc8] sm:$0xff]  ;;  %v130_v42 = vld [vmem:[#allocation5 + $0xd0] sm:$0xff] }
  0x31   :  { %v512_v41 = vpack.c.bf16 %v129_v40, %v128_v39  ;;  %v131_v43 = vld [vmem:[#allocation5 + $0xd8] sm:$0xff]  ;;  %v132_v45 = vld [vmem:[#allocation5 + $0xe0] sm:$0xff]  ;;  %v133_v46 = vld [vmem:[#allocation5 + $0xe8] sm:$0xff] }
  0x32   :  { %483 = vmatpush1.bf16.msra.mxu0 %v482_v9  ;;  %541 = vmatpush1.bf16.msra.mxu1 %v482_v9  ;;  %v515_v44 = vpack.c.bf16 %v131_v43, %v130_v42  ;;  %v518_v47 = vpack.c.bf16 %v133_v46, %v132_v45  ;;  %v134_v48 = vld [vmem:[#allocation5 + $0xf0] sm:$0xff]  ;;  %v135_v49 = vld [vmem:[#allocation5 + $0xf8] sm:$0xff]  ;;  %v40_v51 = vld [vmem:[#allocation2] sm:$0xff] }
  0x33   :  { %484 = vmatprep.subr.bf16.mxu0 %v641_v0  ;;  %526 = vmatprep.subr.bf16.mxu1 %v641_v0  ;;  %v521_v50 = vpack.c.bf16 %v135_v49, %v134_v48  ;;  %v72_v52 = vld [vmem:[#allocation2 + $0x100] sm:$0xff]  ;;  %v43_v53 = vld [vmem:[#allocation2 + $0x18] sm:$0xff]  ;;  %v42_v55 = vld [vmem:[#allocation2 + $0x10] sm:$0xff] }
  0x34   :  { %v75_v54 = vld [vmem:[#allocation2 + $0x118] sm:$0xff]  ;;  %v74_v56 = vld [vmem:[#allocation2 + $0x110] sm:$0xff]  ;;  %v45_v57 = vld [vmem:[#allocation2 + $0x28] sm:$0xff] }
  0x35   :  { %v77_v58 = vld [vmem:[#allocation2 + $0x128] sm:$0xff]  ;;  %v44_v59 = vld [vmem:[#allocation2 + $0x20] sm:$0xff]  ;;  %v47_v61 = vld [vmem:[#allocation2 + $0x38] sm:$0xff] }
  0x36   :  { %486 = vmatpush1.bf16.msra.mxu0 %v485_v13  ;;  %542 = vmatpush1.bf16.msra.mxu1 %v485_v13  ;;  %v76_v60 = vld [vmem:[#allocation2 + $0x120] sm:$0xff]  ;;  %v79_v62 = vld [vmem:[#allocation2 + $0x138] sm:$0xff]  ;;  %v46_v63 = vld [vmem:[#allocation2 + $0x30] sm:$0xff] }
  0x37   :  { %487 = vmatprep.subr.bf16.mxu0 %v641_v0  ;;  %527 = vmatprep.subr.bf16.mxu1 %v641_v0  ;;  %v49_v1 = vld [vmem:[#allocation2 + $0x48] sm:$0xff]  ;;  %v48_v3 = vld [vmem:[#allocation2 + $0x40] sm:$0xff]  ;;  %v51_v5 = vld [vmem:[#allocation2 + $0x58] sm:$0xff] }
  0x38   :  { %v81_v2 = vld [vmem:[#allocation2 + $0x148] sm:$0xff]  ;;  %v80_v4 = vld [vmem:[#allocation2 + $0x140] sm:$0xff]  ;;  %v83_v6 = vld [vmem:[#allocation2 + $0x158] sm:$0xff] }
  0x39   :  { %v50_v7 = vld [vmem:[#allocation2 + $0x50] sm:$0xff]  ;;  %v53_v9 = vld [vmem:[#allocation2 + $0x68] sm:$0xff]  ;;  %v52_v11 = vld [vmem:[#allocation2 + $0x60] sm:$0xff] }
  0x3a   :  { %489 = vmatpush1.bf16.msra.mxu0 %v488_v17  ;;  %543 = vmatpush1.bf16.msra.mxu1 %v488_v17  ;;  %v82_v8 = vld [vmem:[#allocation2 + $0x150] sm:$0xff]  ;;  %v85_v10 = vld [vmem:[#allocation2 + $0x168] sm:$0xff]  ;;  %v84_v12 = vld [vmem:[#allocation2 + $0x160] sm:$0xff] }
  0x3b   :  { %490 = vmatprep.subr.bf16.mxu0 %v641_v0  ;;  %528 = vmatprep.subr.bf16.mxu1 %v641_v0  ;;  %v55_v13 = vld [vmem:[#allocation2 + $0x78] sm:$0xff]  ;;  %v54_v15 = vld [vmem:[#allocation2 + $0x70] sm:$0xff]  ;;  %v57_v17 = vld [vmem:[#allocation2 + $0x88] sm:$0xff] }
  0x3c   :  { %v87_v14 = vld [vmem:[#allocation2 + $0x178] sm:$0xff]  ;;  %v86_v16 = vld [vmem:[#allocation2 + $0x170] sm:$0xff]  ;;  %v89_v18 = vld [vmem:[#allocation2 + $0x188] sm:$0xff] }
  0x3d   :  { %v56_v19 = vld [vmem:[#allocation2 + $0x80] sm:$0xff]  ;;  %v59_v21 = vld [vmem:[#allocation2 + $0x98] sm:$0xff]  ;;  %v90_v24 = vld [vmem:[#allocation2 + $0x190] sm:$0xff] }
  0x3e   :  { %492 = vmatpush1.bf16.msra.mxu0 %v491_v20  ;;  %544 = vmatpush1.bf16.msra.mxu1 %v491_v20  ;;  %v88_v20 = vld [vmem:[#allocation2 + $0x180] sm:$0xff]  ;;  %v91_v22 = vld [vmem:[#allocation2 + $0x198] sm:$0xff]  ;;  %v61_v25 = vld [vmem:[#allocation2 + $0xa8] sm:$0xff] }
  0x3f   :  { %493 = vmatprep.subr.bf16.mxu0 %v641_v0  ;;  %529 = vmatprep.subr.bf16.mxu1 %v641_v0  ;;  %v60_v27 = vld [vmem:[#allocation2 + $0xa0] sm:$0xff]  ;;  %v95_v30 = vld [vmem:[#allocation2 + $0x1b8] sm:$0xff]  ;;  %v62_v31 = vld [vmem:[#allocation2 + $0xb0] sm:$0xff] }
  0x40   :  { %v92_v28 = vld [vmem:[#allocation2 + $0x1a0] sm:$0xff]  ;;  %v65_v33 = vld [vmem:[#allocation2 + $0xc8] sm:$0xff]  ;;  %v67_v37 = vld [vmem:[#allocation2 + $0xd8] sm:$0xff] }
  0x41   :  { %v97_v34 = vld [vmem:[#allocation2 + $0x1c8] sm:$0xff]  ;;  %v96_v36 = vld [vmem:[#allocation2 + $0x1c0] sm:$0xff]  ;;  %v66_v39 = vld [vmem:[#allocation2 + $0xd0] sm:$0xff] }
  0x42   :  { %495 = vmatpush1.bf16.msra.mxu0 %v494_v23  ;;  %545 = vmatpush1.bf16.msra.mxu1 %v494_v23  ;;  %v58_v23 = vld [vmem:[#allocation2 + $0x90] sm:$0xff]  ;;  %v101_v42 = vld [vmem:[#allocation2 + $0x1e8] sm:$0xff]  ;;  %v68_v43 = vld [vmem:[#allocation2 + $0xe0] sm:$0xff] }
  0x43   :  { %496 = vmatprep.subr.bf16.mxu0 %v641_v0  ;;  %530 = vmatprep.subr.bf16.mxu1 %v641_v0  ;;  %v98_v40 = vld [vmem:[#allocation2 + $0x1d0] sm:$0xff]  ;;  %v71_v45 = vld [vmem:[#allocation2 + $0xf8] sm:$0xff] }
  0x44   :  { %v103_v46 = vld [vmem:[#allocation2 + $0x1f8] sm:$0xff]  ;;  %v102_v48 = vld [vmem:[#allocation2 + $0x1f0] sm:$0xff] }
  0x46   :  { %498 = vmatpush1.bf16.msra.mxu0 %v497_v26  ;;  %546 = vmatpush1.bf16.msra.mxu1 %v497_v26  ;;  %v93_v26 = vld [vmem:[#allocation2 + $0x1a8] sm:$0xff] }
  0x47   :  { %499 = vmatprep.subr.bf16.mxu0 %v641_v0  ;;  %531 = vmatprep.subr.bf16.mxu1 %v641_v0 }
  0x4a   :  { %501 = vmatpush1.bf16.msra.mxu0 %v500_v29  ;;  %547 = vmatpush1.bf16.msra.mxu1 %v500_v29  ;;  %v63_v29 = vld [vmem:[#allocation2 + $0xb8] sm:$0xff] }
  0x4b   :  { %502 = vmatprep.subr.bf16.mxu0 %v641_v0  ;;  %532 = vmatprep.subr.bf16.mxu1 %v641_v0 }
  0x4e   :  { %504 = vmatpush1.bf16.msra.mxu0 %v503_v32  ;;  %548 = vmatpush1.bf16.msra.mxu1 %v503_v32  ;;  %v94_v32 = vld [vmem:[#allocation2 + $0x1b0] sm:$0xff] }
  0x4f   :  { %505 = vmatprep.subr.bf16.mxu0 %v641_v0  ;;  %533 = vmatprep.subr.bf16.mxu1 %v641_v0 }
  0x52   :  { %507 = vmatpush1.bf16.msra.mxu0 %v506_v35  ;;  %549 = vmatpush1.bf16.msra.mxu1 %v506_v35  ;;  %v64_v35 = vld [vmem:[#allocation2 + $0xc0] sm:$0xff] }
  0x53   :  { %508 = vmatprep.subr.bf16.mxu0 %v641_v0  ;;  %534 = vmatprep.subr.bf16.mxu1 %v641_v0 }
  0x56   :  { %510 = vmatpush1.bf16.msra.mxu0 %v509_v38  ;;  %550 = vmatpush1.bf16.msra.mxu1 %v509_v38  ;;  %v99_v38 = vld [vmem:[#allocation2 + $0x1d8] sm:$0xff] }
  0x57   :  { %511 = vmatprep.subr.bf16.mxu0 %v641_v0  ;;  %535 = vmatprep.subr.bf16.mxu1 %v641_v0 }
  0x5a   :  { %513 = vmatpush1.bf16.msra.mxu0 %v512_v41  ;;  %551 = vmatpush1.bf16.msra.mxu1 %v512_v41  ;;  %v69_v41 = vld [vmem:[#allocation2 + $0xe8] sm:$0xff] }
  0x5b   :  { %514 = vmatprep.subr.bf16.mxu0 %v641_v0  ;;  %536 = vmatprep.subr.bf16.mxu1 %v641_v0 }
  0x5e   :  { %516 = vmatpush1.bf16.msra.mxu0 %v515_v44  ;;  %552 = vmatpush1.bf16.msra.mxu1 %v515_v44  ;;  %v100_v44 = vld [vmem:[#allocation2 + $0x1e0] sm:$0xff] }
  0x5f   :  { %517 = vmatprep.subr.bf16.mxu0 %v641_v0  ;;  %537 = vmatprep.subr.bf16.mxu1 %v641_v0 }
  0x62   :  { %519 = vmatpush1.bf16.msra.mxu0 %v518_v47  ;;  %553 = vmatpush1.bf16.msra.mxu1 %v518_v47  ;;  %v70_v47 = vld [vmem:[#allocation2 + $0xf0] sm:$0xff] }
  0x63   :  { %520 = vmatprep.subr.bf16.mxu0 %v641_v0  ;;  %538 = vmatprep.subr.bf16.mxu1 %v641_v0  ;;  %v78_v0 = vld [vmem:[#allocation2 + $0x130] sm:$0xff] }
  0x66   :  { %522 = vmatpush1.bf16.msra.mxu0 %v521_v50  ;;  %554 = vmatpush1.bf16.msra.mxu1 %v521_v50 }
  0x69   :  { %201 = vmatmul.mubr.f32.vlgmr.msra.gmra.mrb[0].mxu0 %v40_v51  ;;  %281 = vmatmul.mubr.f32.vlgmr.msra.gmra.mrb[0].mxu1 %v72_v52 }
  0x6a   :  { %205 = vmatprep.mubr.f32.mxu0 %v43_v53  ;;  %285 = vmatprep.mubr.f32.mxu1 %v75_v54 }
  0x6d   :  { %206 = vmatmul.mubr.f32.gmra.mrb[2].mxu0 %v42_v55  ;;  %286 = vmatmul.mubr.f32.gmra.mrb[2].mxu1 %v74_v56 }
  0x6e   :  { %210 = vmatprep.mubr.f32.mxu0 %v45_v57  ;;  %290 = vmatprep.mubr.f32.mxu1 %v77_v58 }
  0x71   :  { %211 = vmatmul.mubr.f32.gmra.mrb[4].mxu0 %v44_v59  ;;  %291 = vmatmul.mubr.f32.gmra.mrb[4].mxu1 %v76_v60 }
  0x72   :  { %215 = vmatprep.mubr.f32.mxu0 %v47_v61  ;;  %295 = vmatprep.mubr.f32.mxu1 %v79_v62 }
  0x75   :  { %216 = vmatmul.mubr.f32.gmra.mrb[6].mxu0 %v46_v63  ;;  %296 = vmatmul.mubr.f32.gmra.mrb[6].mxu1 %v78_v0 }
  0x76   :  { %220 = vmatprep.mubr.f32.mxu0 %v49_v1  ;;  %300 = vmatprep.mubr.f32.mxu1 %v81_v2 }
  0x79   :  { %221 = vmatmul.mubr.f32.gmra.mrb[8].mxu0 %v48_v3  ;;  %301 = vmatmul.mubr.f32.gmra.mrb[8].mxu1 %v80_v4 }
  0x7a   :  { %225 = vmatprep.mubr.f32.mxu0 %v51_v5  ;;  %305 = vmatprep.mubr.f32.mxu1 %v83_v6 }
  0x7d   :  { %226 = vmatmul.mubr.f32.gmra.mrb[10].mxu0 %v50_v7  ;;  %306 = vmatmul.mubr.f32.gmra.mrb[10].mxu1 %v82_v8 }
  0x7e   :  { %230 = vmatprep.mubr.f32.mxu0 %v53_v9  ;;  %310 = vmatprep.mubr.f32.mxu1 %v85_v10 }
  0x81   :  { %231 = vmatmul.mubr.f32.gmra.mrb[12].mxu0 %v52_v11  ;;  %311 = vmatmul.mubr.f32.gmra.mrb[12].mxu1 %v84_v12 }
  0x82   :  { %235 = vmatprep.mubr.f32.mxu0 %v55_v13  ;;  %315 = vmatprep.mubr.f32.mxu1 %v87_v14 }
  0x85   :  { %236 = vmatmul.mubr.f32.gmra.mrb[14].mxu0 %v54_v15  ;;  %316 = vmatmul.mubr.f32.gmra.mrb[14].mxu1 %v86_v16 }
  0x86   :  { %240 = vmatprep.mubr.f32.mxu0 %v57_v17  ;;  %320 = vmatprep.mubr.f32.mxu1 %v89_v18 }
  0x89   :  { %241 = vmatmul.mubr.f32.gmra.mrb[16].mxu0 %v56_v19  ;;  %321 = vmatmul.mubr.f32.gmra.mrb[16].mxu1 %v88_v20 }
  0x8a   :  { %245 = vmatprep.mubr.f32.mxu0 %v59_v21  ;;  %325 = vmatprep.mubr.f32.mxu1 %v91_v22 }
  0x8d   :  { %246 = vmatmul.mubr.f32.gmra.mrb[18].mxu0 %v58_v23  ;;  %326 = vmatmul.mubr.f32.gmra.mrb[18].mxu1 %v90_v24 }
  0x8e   :  { %250 = vmatprep.mubr.f32.mxu0 %v61_v25  ;;  %330 = vmatprep.mubr.f32.mxu1 %v93_v26 }
  0x91   :  { %251 = vmatmul.mubr.f32.gmra.mrb[20].mxu0 %v60_v27  ;;  %331 = vmatmul.mubr.f32.gmra.mrb[20].mxu1 %v92_v28 }
  0x92   :  { %255 = vmatprep.mubr.f32.mxu0 %v63_v29  ;;  %335 = vmatprep.mubr.f32.mxu1 %v95_v30 }
  0x95   :  { %256 = vmatmul.mubr.f32.gmra.mrb[22].mxu0 %v62_v31  ;;  %336 = vmatmul.mubr.f32.gmra.mrb[22].mxu1 %v94_v32 }
  0x96   :  { %260 = vmatprep.mubr.f32.mxu0 %v65_v33  ;;  %340 = vmatprep.mubr.f32.mxu1 %v97_v34 }
  0x99   :  { %261 = vmatmul.mubr.f32.gmra.mrb[24].mxu0 %v64_v35  ;;  %341 = vmatmul.mubr.f32.gmra.mrb[24].mxu1 %v96_v36 }
  0x9a   :  { %265 = vmatprep.mubr.f32.mxu0 %v67_v37  ;;  %345 = vmatprep.mubr.f32.mxu1 %v99_v38 }
  0x9d   :  { %266 = vmatmul.mubr.f32.gmra.mrb[26].mxu0 %v66_v39  ;;  %346 = vmatmul.mubr.f32.gmra.mrb[26].mxu1 %v98_v40 }
  0x9e   :  { %270 = vmatprep.mubr.f32.mxu0 %v69_v41  ;;  %350 = vmatprep.mubr.f32.mxu1 %v101_v42 }
  0xa1   :  { %271 = vmatmul.mubr.f32.gmra.mrb[28].mxu0 %v68_v43  ;;  %351 = vmatmul.mubr.f32.gmra.mrb[28].mxu1 %v100_v44 }
  0xa2   :  { %275 = vmatprep.mubr.f32.mxu0 %v71_v45  ;;  %355 = vmatprep.mubr.f32.mxu1 %v103_v46 }
  0xa5   :  { %276 = vmatmul.mubr.f32.gmra.mrb[30].mxu0 %v70_v47  ;;  %356 = vmatmul.mubr.f32.gmra.mrb[30].mxu1 %v102_v48 }
 0x13c   :  { %v202_v49 = vpop.f32.mrb[0].mxu0  ;;  %v282_v50 = vpop.f32.mrb[0].mxu1 }
 0x13d   :  { %v361_v51 = vmul.f32 0.5, %v202_v49  ;;  %v377_v52 = vmul.f32 0.5, %v282_v50  ;;  %v204_v53 = vpop.f32.mrb[1].mxu0  ;;  %v284_v54 = vpop.f32.mrb[1].mxu1 }
 0x13f   :  { %v393_v55 = vmax.f32 %v202_v49, %v361_v51  ;;  %v409_v56 = vmax.f32 %v282_v50, %v377_v52 }
 0x140   :  { %v207_v57 = vpop.f32.mrb[2].mxu0  ;;  %v287_v58 = vpop.f32.mrb[2].mxu1 }
 0x141   :  { %425 = vst [vmem:[#allocation7] sm:$0xff] %v393_v55  ;;  %441 = vst [vmem:[#allocation7 + $0x80] sm:$0xff] %v409_v56  ;;  %v362_v59 = vmul.f32 0.5, %v207_v57  ;;  %v378_v60 = vmul.f32 0.5, %v287_v58  ;;  %v209_v61 = vpop.f32.mrb[3].mxu0  ;;  %v289_v62 = vpop.f32.mrb[3].mxu1 }
 0x143   :  { %v394_v63 = vmax.f32 %v207_v57, %v362_v59  ;;  %v410_v0 = vmax.f32 %v287_v58, %v378_v60 }
 0x144   :  { %v212_v1 = vpop.f32.mrb[4].mxu0  ;;  %v292_v2 = vpop.f32.mrb[4].mxu1 }
 0x145   :  { %426 = vst [vmem:[#allocation7 + $0x8] sm:$0xff] %v394_v63  ;;  %442 = vst [vmem:[#allocation7 + $0x88] sm:$0xff] %v410_v0  ;;  %v363_v3 = vmul.f32 0.5, %v212_v1  ;;  %v379_v4 = vmul.f32 0.5, %v292_v2  ;;  %v214_v5 = vpop.f32.mrb[5].mxu0  ;;  %v294_v6 = vpop.f32.mrb[5].mxu1 }
 0x147   :  { %v395_v7 = vmax.f32 %v212_v1, %v363_v3  ;;  %v411_v8 = vmax.f32 %v292_v2, %v379_v4 }
 0x148   :  { %v217_v9 = vpop.f32.mrb[6].mxu0  ;;  %v297_v10 = vpop.f32.mrb[6].mxu1 }
 0x149   :  { %427 = vst [vmem:[#allocation7 + $0x10] sm:$0xff] %v395_v7  ;;  %443 = vst [vmem:[#allocation7 + $0x90] sm:$0xff] %v411_v8  ;;  %v364_v11 = vmul.f32 0.5, %v217_v9  ;;  %v380_v12 = vmul.f32 0.5, %v297_v10  ;;  %v219_v13 = vpop.f32.mrb[7].mxu0  ;;  %v299_v14 = vpop.f32.mrb[7].mxu1 }
 0x14b   :  { %v396_v15 = vmax.f32 %v217_v9, %v364_v11  ;;  %v412_v16 = vmax.f32 %v297_v10, %v380_v12 }
 0x14c   :  { %v222_v17 = vpop.f32.mrb[8].mxu0  ;;  %v302_v18 = vpop.f32.mrb[8].mxu1 }
 0x14d   :  { %428 = vst [vmem:[#allocation7 + $0x18] sm:$0xff] %v396_v15  ;;  %444 = vst [vmem:[#allocation7 + $0x98] sm:$0xff] %v412_v16  ;;  %v365_v19 = vmul.f32 0.5, %v222_v17  ;;  %v381_v20 = vmul.f32 0.5, %v302_v18  ;;  %v224_v21 = vpop.f32.mrb[9].mxu0  ;;  %v304_v22 = vpop.f32.mrb[9].mxu1 }
 0x14f   :  { %v397_v23 = vmax.f32 %v222_v17, %v365_v19  ;;  %v413_v24 = vmax.f32 %v302_v18, %v381_v20 }
 0x150   :  { %v227_v25 = vpop.f32.mrb[10].mxu0  ;;  %v307_v26 = vpop.f32.mrb[10].mxu1 }
 0x151   :  { %429 = vst [vmem:[#allocation7 + $0x20] sm:$0xff] %v397_v23  ;;  %445 = vst [vmem:[#allocation7 + $0xa0] sm:$0xff] %v413_v24  ;;  %v366_v27 = vmul.f32 0.5, %v227_v25  ;;  %v382_v28 = vmul.f32 0.5, %v307_v26  ;;  %v229_v29 = vpop.f32.mrb[11].mxu0  ;;  %v309_v30 = vpop.f32.mrb[11].mxu1 }
 0x153   :  { %v398_v31 = vmax.f32 %v227_v25, %v366_v27  ;;  %v414_v32 = vmax.f32 %v307_v26, %v382_v28 }
 0x154   :  { %v232_v33 = vpop.f32.mrb[12].mxu0  ;;  %v312_v34 = vpop.f32.mrb[12].mxu1 }
 0x155   :  { %430 = vst [vmem:[#allocation7 + $0x28] sm:$0xff] %v398_v31  ;;  %446 = vst [vmem:[#allocation7 + $0xa8] sm:$0xff] %v414_v32  ;;  %v367_v35 = vmul.f32 0.5, %v232_v33  ;;  %v383_v36 = vmul.f32 0.5, %v312_v34  ;;  %v234_v37 = vpop.f32.mrb[13].mxu0  ;;  %v314_v38 = vpop.f32.mrb[13].mxu1 }
 0x157   :  { %v399_v39 = vmax.f32 %v232_v33, %v367_v35  ;;  %v415_v40 = vmax.f32 %v312_v34, %v383_v36 }
 0x158   :  { %v237_v41 = vpop.f32.mrb[14].mxu0  ;;  %v317_v42 = vpop.f32.mrb[14].mxu1 }
 0x159   :  { %431 = vst [vmem:[#allocation7 + $0x30] sm:$0xff] %v399_v39  ;;  %447 = vst [vmem:[#allocation7 + $0xb0] sm:$0xff] %v415_v40  ;;  %v368_v43 = vmul.f32 0.5, %v237_v41  ;;  %v384_v44 = vmul.f32 0.5, %v317_v42  ;;  %v239_v45 = vpop.f32.mrb[15].mxu0  ;;  %v319_v46 = vpop.f32.mrb[15].mxu1 }
 0x15b   :  { %v400_v47 = vmax.f32 %v237_v41, %v368_v43  ;;  %v416_v48 = vmax.f32 %v317_v42, %v384_v44 }
 0x15c   :  { %v242_v49 = vpop.f32.mrb[16].mxu0  ;;  %v322_v50 = vpop.f32.mrb[16].mxu1 }
 0x15d   :  { %432 = vst [vmem:[#allocation7 + $0x38] sm:$0xff] %v400_v47  ;;  %448 = vst [vmem:[#allocation7 + $0xb8] sm:$0xff] %v416_v48  ;;  %v369_v51 = vmul.f32 0.5, %v242_v49  ;;  %v385_v52 = vmul.f32 0.5, %v322_v50  ;;  %v244_v53 = vpop.f32.mrb[17].mxu0  ;;  %v324_v54 = vpop.f32.mrb[17].mxu1 }
 0x15f   :  { %v401_v55 = vmax.f32 %v242_v49, %v369_v51  ;;  %v417_v56 = vmax.f32 %v322_v50, %v385_v52 }
 0x160   :  { %v247_v57 = vpop.f32.mrb[18].mxu0  ;;  %v327_v58 = vpop.f32.mrb[18].mxu1 }
 0x161   :  { %433 = vst [vmem:[#allocation7 + $0x40] sm:$0xff] %v401_v55  ;;  %449 = vst [vmem:[#allocation7 + $0xc0] sm:$0xff] %v417_v56  ;;  %v370_v59 = vmul.f32 0.5, %v247_v57  ;;  %v386_v60 = vmul.f32 0.5, %v327_v58  ;;  %v249_v61 = vpop.f32.mrb[19].mxu0  ;;  %v329_v62 = vpop.f32.mrb[19].mxu1 }
 0x163   :  { %v402_v63 = vmax.f32 %v247_v57, %v370_v59  ;;  %v418_v0 = vmax.f32 %v327_v58, %v386_v60 }
 0x164   :  { %v252_v1 = vpop.f32.mrb[20].mxu0  ;;  %v332_v2 = vpop.f32.mrb[20].mxu1 }
 0x165   :  { %434 = vst [vmem:[#allocation7 + $0x48] sm:$0xff] %v402_v63  ;;  %450 = vst [vmem:[#allocation7 + $0xc8] sm:$0xff] %v418_v0  ;;  %v371_v3 = vmul.f32 0.5, %v252_v1  ;;  %v387_v4 = vmul.f32 0.5, %v332_v2  ;;  %v254_v5 = vpop.f32.mrb[21].mxu0  ;;  %v334_v6 = vpop.f32.mrb[21].mxu1 }
 0x167   :  { %v403_v7 = vmax.f32 %v252_v1, %v371_v3  ;;  %v419_v8 = vmax.f32 %v332_v2, %v387_v4 }
 0x168   :  { %v257_v9 = vpop.f32.mrb[22].mxu0  ;;  %v337_v10 = vpop.f32.mrb[22].mxu1 }
 0x169   :  { %435 = vst [vmem:[#allocation7 + $0x50] sm:$0xff] %v403_v7  ;;  %451 = vst [vmem:[#allocation7 + $0xd0] sm:$0xff] %v419_v8  ;;  %v372_v11 = vmul.f32 0.5, %v257_v9  ;;  %v388_v12 = vmul.f32 0.5, %v337_v10  ;;  %v259_v13 = vpop.f32.mrb[23].mxu0  ;;  %v339_v14 = vpop.f32.mrb[23].mxu1 }
 0x16b   :  { %v404_v15 = vmax.f32 %v257_v9, %v372_v11  ;;  %v420_v16 = vmax.f32 %v337_v10, %v388_v12 }
 0x16c   :  { %v262_v17 = vpop.f32.mrb[24].mxu0  ;;  %v342_v18 = vpop.f32.mrb[24].mxu1 }
 0x16d   :  { %436 = vst [vmem:[#allocation7 + $0x58] sm:$0xff] %v404_v15  ;;  %452 = vst [vmem:[#allocation7 + $0xd8] sm:$0xff] %v420_v16  ;;  %v373_v19 = vmul.f32 0.5, %v262_v17  ;;  %v389_v20 = vmul.f32 0.5, %v342_v18  ;;  %v264_v21 = vpop.f32.mrb[25].mxu0  ;;  %v344_v22 = vpop.f32.mrb[25].mxu1 }
 0x16f   :  { %v405_v23 = vmax.f32 %v262_v17, %v373_v19  ;;  %v421_v24 = vmax.f32 %v342_v18, %v389_v20 }
 0x170   :  { %v267_v25 = vpop.f32.mrb[26].mxu0  ;;  %v347_v26 = vpop.f32.mrb[26].mxu1 }
 0x171   :  { %437 = vst [vmem:[#allocation7 + $0x60] sm:$0xff] %v405_v23  ;;  %453 = vst [vmem:[#allocation7 + $0xe0] sm:$0xff] %v421_v24  ;;  %v374_v27 = vmul.f32 0.5, %v267_v25  ;;  %v390_v28 = vmul.f32 0.5, %v347_v26  ;;  %v269_v29 = vpop.f32.mrb[27].mxu0  ;;  %v349_v30 = vpop.f32.mrb[27].mxu1 }
 0x173   :  { %v406_v31 = vmax.f32 %v267_v25, %v374_v27  ;;  %v422_v32 = vmax.f32 %v347_v26, %v390_v28 }
 0x174   :  { %v272_v33 = vpop.f32.mrb[28].mxu0  ;;  %v352_v34 = vpop.f32.mrb[28].mxu1 }
 0x175   :  { %438 = vst [vmem:[#allocation7 + $0x68] sm:$0xff] %v406_v31  ;;  %454 = vst [vmem:[#allocation7 + $0xe8] sm:$0xff] %v422_v32  ;;  %v375_v35 = vmul.f32 0.5, %v272_v33  ;;  %v391_v36 = vmul.f32 0.5, %v352_v34  ;;  %v274_v37 = vpop.f32.mrb[29].mxu0  ;;  %v354_v38 = vpop.f32.mrb[29].mxu1 }
 0x177   :  { %v407_v39 = vmax.f32 %v272_v33, %v375_v35  ;;  %v423_v40 = vmax.f32 %v352_v34, %v391_v36 }
 0x178   :  { %v277_v41 = vpop.f32.mrb[30].mxu0  ;;  %v357_v42 = vpop.f32.mrb[30].mxu1 }
 0x179   :  { %439 = vst [vmem:[#allocation7 + $0x70] sm:$0xff] %v407_v39  ;;  %455 = vst [vmem:[#allocation7 + $0xf0] sm:$0xff] %v423_v40  ;;  %v376_v43 = vmul.f32 0.5, %v277_v41  ;;  %v392_v44 = vmul.f32 0.5, %v357_v42  ;;  %v279_v45 = vpop.f32.mrb[31].mxu0  ;;  %v359_v46 = vpop.f32.mrb[31].mxu1 }
 0x17b   :  { %v408_v47 = vmax.f32 %v277_v41, %v376_v43  ;;  %v424_v48 = vmax.f32 %v357_v42, %v392_v44 }
 0x17d   :  { %440 = vst [vmem:[#allocation7 + $0x78] sm:$0xff] %v408_v47  ;;  %456 = vst [vmem:[#allocation7 + $0xf8] sm:$0xff] %v424_v48 }
 0x17e   :  { %618 = shalt.err (!%p615_p6)
}
 0x17f   :  { %s619_s12 = scalar_lea.hbm %s734_s2, 4096 }
 0x180   :  { %p620_p7 = scmp.ne.s32.totalorder %s734_s2, %s619_s12  ;;  %p623_p8 = scmp.lt.u32.totalorder %s619_s12, %s734_s2 }
 0x182   :  { %p625_p9 = pnand %p623_p8, %p620_p7 }
 0x184   :  { %628 = shalt.err (!%p625_p9)
}
 0x185   :  { %468 = dma.vmem_to_hbm [thread:$0]  %s463_s8, 4096, %s734_s2, [#allocation4], %s639_s0, %s639_s0, %s640_s5  }
 0x186   :  { %633 = dma.done.wait [#allocation4], 4096  }
 0x187   :  { %634 = vsyncadd [#allocation4], 4294963200 }
 0x188   :  { %472 = vsyncpa [#allocation3], 1 }
 0x189   :  { %473 = vsyncpa [#allocation6], 1 }
 0x18a   :  { %474 = vsyncpa [#allocation4], 1 }

</bundles_post_ra>
